<compile_context>
chip_gen: v5e
topology: v5e:2x2
jax: 0.10.0
libtpu: 0.0.40
codegen_flags: <defaults>
</compile_context>

<pallas_src>
import math

import jax
import jax.numpy as jnp
from jax import lax
from jax.experimental import pallas as pl
from jax.experimental.pallas import tpu as pltpu


def _make_focal_partial_kernel(n_rows: int, tile_n: int, n_classes: int):
    def kernel(logits_ref, target_ref, out_ref, acc_ref):
        c = pl.program_id(0)          # slice index       ("parallel")
        i = pl.program_id(1)          # row-tile in slice ("arbitrary")

        @pl.when(i == 0)
        def _init():
            acc_ref[...] = jnp.zeros_like(acc_ref)

        logits = logits_ref[...].astype(jnp.float32)        # (tile_n, C) f32
        tgt = target_ref[...]                               # (tile_n, 1) i32

        # Row-validity mask from the *unclamped* logical block index, so
        # clamped / padded tail tiles contribute exactly zero to the sum.
        logical_block = c * pl.num_programs(1) + i
        row = logical_block * tile_n + lax.broadcasted_iota(
            jnp.int32, (tile_n, 1), 0)
        valid = row < n_rows                                 # (tile_n, 1)

        # Numerically stable log-sum-exp over classes (lane axis).
        m = jnp.max(logits, axis=-1, keepdims=True)
        lse = m + jnp.log(jnp.sum(jnp.exp(logits - m), axis=-1, keepdims=True))

        # logits[r, target[r]] via iota compare + select (no bool->f32 mul).
        col = lax.broadcasted_iota(jnp.int32, (tile_n, n_classes), 1)
        picked = jnp.sum(jnp.where(col == tgt, logits, 0.0),
                         axis=-1, keepdims=True)             # (tile_n, 1)

        nll = jnp.where(valid, lse - picked, 0.0)            # (tile_n, 1)
        acc_ref[...] += jnp.sum(nll, keepdims=True)          # (1, 1)

        @pl.when(i == pl.num_programs(1) - 1)
        def _flush():
            # Broadcast the scalar partial into the whole lane-dense (8,128)
            # output block so the final store is unmasked.
            out_ref[...] = jnp.broadcast_to(acc_ref[...], out_ref.shape)

    return kernel


def _choose_tile_n(n_rows: int, n_classes: int) -> int:
    # ~2 MiB of f32 per logits tile keeps double buffering plus in-kernel f32
    # intermediates comfortably under the 16/32 MiB scoped VMEM defaults
    # (v5e / v6e / v7x).
    target_bytes = 2 * 1024 * 1024
    t = max(8, min(target_bytes // max(4 * n_classes, 1), 2048))
    t = (t // 8) * 8
    n_pad8 = ((n_rows + 7) // 8) * 8
    return min(t, n_pad8)


def focal_loss(logits: jax.Array, targets: jax.Array, gamma: float = 0.0,
               eps: float = 1e-07, tile_n: int | None = None) -> jax.Array:
    """Pallas TPU implementation of FocalLoss.forward.

    logits:  (N, C) float (any float dtype; streamed in native dtype)
    targets: (N,)   int class indices
    returns: scalar float32 loss
    """
    del eps  # unused in the reference forward pass; kept for signature parity
    n_rows, n_classes = logits.shape
    if tile_n is None:
        tile_n = _choose_tile_n(n_rows, n_classes)
    tile_n = max(8, (tile_n // 8) * 8)

    n_blocks = pl.cdiv(n_rows, tile_n)
    num_slices = min(2, n_blocks)             # 2 -> maps to v7x's two TCs
    tiles_per_slice = pl.cdiv(n_blocks, num_slices)

    # Per-row class index on the sublane matching its logits row.
    targets_col = targets.astype(jnp.int32).reshape(n_rows, 1)

    def row_block(c, i):
        # Clamp so padded grid points never DMA out of bounds; their rows are
        # zeroed inside the kernel via the unclamped logical index.
        return jnp.minimum(c * tiles_per_slice + i, n_blocks - 1)

    out = pl.pallas_call(
        _make_focal_partial_kernel(n_rows, tile_n, n_classes),
        out_shape=jax.ShapeDtypeStruct((num_slices * 8, 128), jnp.float32),
        grid_spec=pltpu.PrefetchScalarGridSpec(
            num_scalar_prefetch=0,
            grid=(num_slices, tiles_per_slice),
            in_specs=[
                pl.BlockSpec((tile_n, n_classes),
                             lambda c, i: (row_block(c, i), 0)),
                pl.BlockSpec((tile_n, 1),
                             lambda c, i: (row_block(c, i), 0)),
            ],
            out_specs=pl.BlockSpec((8, 128), lambda c, i: (c, 0)),
            scratch_shapes=[pltpu.VMEM((1, 1), jnp.float32)],
        ),
        compiler_params=pltpu.CompilerParams(
            dimension_semantics=("parallel", "arbitrary"),
            vmem_limit_bytes=32 * 1024 * 1024,
        ),
    )(logits, targets_col)

    # Per-slice partial CE sums live at rows 0, 8, 16, ... in lane 0.
    ce = jnp.sum(out[::8, 0]) / n_rows          # mean CE over the true N
    p = jnp.exp(-ce)
    return (1.0 - p) ** gamma * ce


def focal_loss_ref(logits, targets, gamma=0.0):
    """Pure-JAX reference mirroring the PyTorch module."""
    logits = logits.astype(jnp.float32)
    logp_all = jax.nn.log_softmax(logits, axis=-1)
    nll = -jnp.take_along_axis(logp_all, targets[:, None].astype(jnp.int32),
                               axis=-1)[:, 0]
    logp = jnp.mean(nll)
    p = jnp.exp(-logp)
    return (1.0 - p) ** gamma * logp


if __name__ == "__main__":
    key = jax.random.PRNGKey(0)
    k1, k2, k3, k4 = jax.random.split(key, 4)
    gamma = 2.0

    # Case 1: tiny single-tile problem (N=8, C=32), auto tile size.
    n1, c1 = 8, 32
    logits1 = jax.random.normal(k1, (n1, c1), dtype=jnp.float32)
    targets1 = jax.random.randint(k2, (n1,), 0, c1, dtype=jnp.int32)
    out1 = jax.block_until_ready(focal_loss(logits1, targets1, gamma=gamma))
    ref1 = focal_loss_ref(logits1, targets1, gamma=gamma)
    assert jnp.allclose(out1, ref1, rtol=1e-5, atol=1e-5), (out1, ref1)

    # Case 2: ragged N with a forced small tile to exercise the grid, the
    # two-slice split, clamped tail blocks, and the validity mask.
    n2, c2 = 37, 32
    logits2 = jax.random.normal(k3, (n2, c2), dtype=jnp.float32)
    targets2 = jax.random.randint(k4, (n2,), 0, c2, dtype=jnp.int32)
    out2 = jax.block_until_ready(
        focal_loss(logits2, targets2, gamma=gamma, tile_n=8))
    ref2 = focal_loss_ref(logits2, targets2, gamma=gamma)
    assert jnp.allclose(out2, ref2, rtol=1e-5, atol=1e-5), (out2, ref2)

    assert math.isfinite(float(out1)) and math.isfinite(float(out2))

    print("KERNEL_OK")
</pallas_src>

<mosaic_0001>
module attributes {stable_mosaic.version = 11 : i64} {
  func.func @kernel(%arg0: i32, %arg1: i32, %arg2: memref<8x32xf32, #tpu.memory_space<vmem>>, %arg3: memref<8x1xi32, #tpu.memory_space<vmem>>, %arg4: memref<8x128xf32, #tpu.memory_space<vmem>>, %arg5: memref<1x1xf32, #tpu.memory_space<vmem>>) attributes {dimension_semantics = [#tpu.dimension_semantics<parallel>, #tpu.dimension_semantics<arbitrary>], iteration_bounds = array<i64: 1, 1>, scalar_prefetch = 0 : i64, scratch_operands = 1 : i64, tpu.core_type = #tpu.core_type<tc>, window_params = [{transform_indices = @transform_0, window_bounds = array<i64: 8, 32>}, {transform_indices = @transform_1, window_bounds = array<i64: 8, 1>}, {transform_indices = @transform_2, window_bounds = array<i64: 8, 128>}]} {
    %c0_i32 = arith.constant 0 : i32
    %0 = arith.cmpi eq, %arg1, %c0_i32 : i32
    %1 = arith.extui %0 : i1 to i32
    %c0_i32_0 = arith.constant 0 : i32
    %2 = arith.cmpi ne, %1, %c0_i32_0 : i32
    scf.if %2 {
      %cst_16 = arith.constant 0.000000e+00 : f32
      %43 = vector.broadcast %cst_16 : f32 to vector<1x1xf32>
      %c0_17 = arith.constant 0 : index
      %c0_18 = arith.constant 0 : index
      %44 = vector.load %arg5[%c0_17, %c0_18] : memref<1x1xf32, #tpu.memory_space<vmem>>, vector<1x1xf32>
      tpu.vector_store %arg5[%c0_17, %c0_18], %43 {strides = array<i32>} : memref<1x1xf32, #tpu.memory_space<vmem>>, vector<1x1xf32>,
    } else {
    }
    %c0 = arith.constant 0 : index
    %c0_1 = arith.constant 0 : index
    %3 = vector.load %arg2[%c0, %c0_1] : memref<8x32xf32, #tpu.memory_space<vmem>>, vector<8x32xf32>
    %c0_2 = arith.constant 0 : index
    %c0_3 = arith.constant 0 : index
    %4 = vector.load %arg3[%c0_2, %c0_3] : memref<8x1xi32, #tpu.memory_space<vmem>>, vector<8x1xi32>
    %c1_i32 = arith.constant 1 : i32
    %5 = arith.muli %arg0, %c1_i32 : i32
    %6 = arith.addi %5, %arg1 : i32
    %c8_i32 = arith.constant 8 : i32
    %7 = arith.muli %6, %c8_i32 : i32
    %8 = tpu.iota {dimensions = array<i32: 0>} : vector<8x1xi32>
    %9 = vector.broadcast %7 : i32 to vector<8x1xi32>
    %10 = arith.addi %9, %8 : vector<8x1xi32>
    %c8_i32_4 = arith.constant 8 : i32
    %11 = vector.broadcast %c8_i32_4 : i32 to vector<8x1xi32>
    %12 = arith.cmpi slt, %10, %11 : vector<8x1xi32>
    %cst = arith.constant dense<0xFF800000> : vector<8xf32>
    %13 = vector.multi_reduction <maximumf>, %3, %cst [1] : vector<8x32xf32> to vector<8xf32>
    %14 = vector.shape_cast %13 : vector<8xf32> to vector<8x1xf32>
    %15 = vector.broadcast %14 : vector<8x1xf32> to vector<8x32xf32>
    %16 = arith.subf %3, %15 : vector<8x32xf32>
    %17 = math.exp %16 : vector<8x32xf32>
    %cst_5 = arith.constant dense<0.000000e+00> : vector<8xf32>
    %18 = vector.multi_reduction <add>, %17, %cst_5 [1] : vector<8x32xf32> to vector<8xf32>
    %19 = vector.shape_cast %18 : vector<8xf32> to vector<8x1xf32>
    %20 = math.log %19 : vector<8x1xf32>
    %21 = arith.addf %14, %20 : vector<8x1xf32>
    %22 = tpu.iota {dimensions = array<i32: 1>} : vector<8x32xi32>
    %23 = vector.broadcast %4 : vector<8x1xi32> to vector<8x32xi32>
    %24 = arith.cmpi eq, %22, %23 : vector<8x32xi32>
    %cst_6 = arith.constant 0.000000e+00 : f32
    %25 = vector.broadcast %cst_6 : f32 to vector<8x32xf32>
    %26 = arith.select %24, %3, %25 : vector<8x32xi1>, vector<8x32xf32>
    %cst_7 = arith.constant dense<0.000000e+00> : vector<8xf32>
    %27 = vector.multi_reduction <add>, %26, %cst_7 [1] : vector<8x32xf32> to vector<8xf32>
    %28 = vector.shape_cast %27 : vector<8xf32> to vector<8x1xf32>
    %29 = arith.subf %21, %28 : vector<8x1xf32>
    %cst_8 = arith.constant 0.000000e+00 : f32
    %30 = vector.broadcast %cst_8 : f32 to vector<8x1xf32>
    %31 = arith.select %12, %29, %30 : vector<8x1xi1>, vector<8x1xf32>
    %c0_9 = arith.constant 0 : index
    %c0_10 = arith.constant 0 : index
    %32 = vector.load %arg5[%c0_9, %c0_10] : memref<1x1xf32, #tpu.memory_space<vmem>>, vector<1x1xf32>
    %33 = vector.shape_cast %31 : vector<8x1xf32> to vector<1x8x1xf32>
    %cst_11 = arith.constant dense<0.000000e+00> : vector<1xf32>
    %34 = vector.multi_reduction <add>, %33, %cst_11 [1, 2] : vector<1x8x1xf32> to vector<1xf32>
    %35 = vector.shape_cast %34 : vector<1xf32> to vector<1x1x1xf32>
    %36 = vector.extract %35[0, 0, 0] : f32 from vector<1x1x1xf32>
    %37 = vector.broadcast %36 : f32 to vector<1x1xf32>
    %38 = arith.addf %32, %37 : vector<1x1xf32>
    %c0_12 = arith.constant 0 : index
    %c0_13 = arith.constant 0 : index
    %39 = vector.load %arg5[%c0_12, %c0_13] : memref<1x1xf32, #tpu.memory_space<vmem>>, vector<1x1xf32>
    tpu.vector_store %arg5[%c0_12, %c0_13], %38 {strides = array<i32>} : memref<1x1xf32, #tpu.memory_space<vmem>>, vector<1x1xf32>,
    %c0_i32_14 = arith.constant 0 : i32
    %40 = arith.cmpi eq, %arg1, %c0_i32_14 : i32
    %41 = arith.extui %40 : i1 to i32
    %c0_i32_15 = arith.constant 0 : i32
    %42 = arith.cmpi ne, %41, %c0_i32_15 : i32
    scf.if %42 {
      %c0_16 = arith.constant 0 : index
      %c0_17 = arith.constant 0 : index
      %43 = vector.load %arg5[%c0_16, %c0_17] : memref<1x1xf32, #tpu.memory_space<vmem>>, vector<1x1xf32>
      %44 = vector.shape_cast %43 : vector<1x1xf32> to vector<1x1xf32>
      %45 = vector.broadcast %44 : vector<1x1xf32> to vector<8x128xf32>
      %c0_18 = arith.constant 0 : index
      %c0_19 = arith.constant 0 : index
      %46 = vector.load %arg4[%c0_18, %c0_19] : memref<8x128xf32, #tpu.memory_space<vmem>>, vector<8x128xf32>
      tpu.vector_store %arg4[%c0_18, %c0_19], %45 {strides = array<i32>} : memref<8x128xf32, #tpu.memory_space<vmem>>, vector<8x128xf32>,
    } else {
    }
    return
  }
  func.func @transform_0(%arg0: i32, %arg1: i32) -> (i32, i32) {
    %c1_i32 = arith.constant 1 : i32
    %0 = arith.muli %arg0, %c1_i32 : i32
    %1 = arith.addi %0, %arg1 : i32
    %c0_i32 = arith.constant 0 : i32
    %2 = arith.minsi %1, %c0_i32 : i32
    %c0_i32_0 = arith.constant 0 : i32
    %c0_i32_1 = arith.constant 0 : i32
    return %2, %c0_i32_0 : i32, i32
  }
  func.func @transform_1(%arg0: i32, %arg1: i32) -> (i32, i32) {
    %c1_i32 = arith.constant 1 : i32
    %0 = arith.muli %arg0, %c1_i32 : i32
    %1 = arith.addi %0, %arg1 : i32
    %c0_i32 = arith.constant 0 : i32
    %2 = arith.minsi %1, %c0_i32 : i32
    %c0_i32_0 = arith.constant 0 : i32
    %c0_i32_1 = arith.constant 0 : i32
    return %2, %c0_i32_0 : i32, i32
  }
  func.func @transform_2(%arg0: i32, %arg1: i32) -> (i32, i32) {
    %c0_i32 = arith.constant 0 : i32
    %c0_i32_0 = arith.constant 0 : i32
    return %arg0, %c0_i32 : i32, i32
  }
}

</mosaic_0001>

<bundles_post_ra>
// kernel: tpu_custom_call.1
= control target key start
LH: loop header
LB: loop body
LE: loop exit
PB: predicated region body
PF: predicated region fallthrough
CT: control target
= control target key end

     0   :  { %vm81_vm0 = vcmask 261120   ;;  %s229_s0 = inlined_call_operand.vmem [shape: f32[8,32], index: 0, kind: input, shape index: {}]   ;;  %s230_s1 = inlined_call_operand.vmem [shape: s32[8,1], index: 1, kind: input, shape index: {}]   ;;  %s231_s2 = inlined_call_operand.hbm [shape: f32[8,128], index: 2, kind: output, shape index: {}]  }
   0x1   :  { %v72_v0 = vld [vmem:[%s229_s0] sm:$0xff] }
   0x2   :  { %7 = vsyncpa [#allocation4], 0  ;;  %v82_v1 = vsel %vm81_vm0, %v72_v0, -inf  ;;  %v199_v2 = vmov 0   ;;  %v73_v3 = vld [vmem:[%s230_s1] sm:$0xff]  ;;  %v94_v9 = vlaneseq  ;;  %vm107_vm2 = vcmask 7168  }
   0x3   :  { %166 = vset.pattern.permute.xlu0 %v199_v2  ;;  %167 = vset.pattern.permute.xlu2 %v199_v2  ;;  %vm70_vm3 = vcmask 0   ;;  %v200_v21 = vmov 0.0   ;;  %s201_s1 = smov [#allocation3]   ;;  %s140_s16 = sshll.u32 %s231_s2, 4  ;;  %s141_s16 = int_to_ptr.hbm [resolvable:$true] %s140_s16 }
   0x4   :  { %83 = vmax.xlane.f32.xlu0 %v82_v1  ;;  %v95_v10 = vand.u32 127, %v94_v9  ;;  %71 = vst.msk [vmem:[#allocation2] sm:$0x1] %vm70_vm3, %v200_v21  ;;  %s138_s13 = sshll.u32 %s201_s1, 4  ;;  %s139_s13 = int_to_ptr.vmem [resolvable:$true] %s138_s13 }
   0xb   :  { %v106_v29 = vld [vmem:[#allocation2] sm:$0x1] }
  0x18   :  { %97 = vperm.xlu0 %166, %v73_v3  }
  0x77   :  { %v84_v4 = vpop.xlane.xlu0 %83 }
  0x78   :  { %v85_v5 = vsub.f32 %v72_v0, %v84_v4 }
  0x7a   :  { %v86_v6 = vmul.f32 1.442695, %v85_v5 }
  0x7c   :  { %169 = vpow2.f32 %v86_v6 }
  0x82   :  { %v170_v7 = vpop.eup %169 }
  0x83   :  { %v88_v8 = vsel %vm81_vm0, %v170_v7, 0.0 }
  0x84   :  { %89 = vadd.xlane.f32.xlu1 %v88_v8 }
  0x8a   :  { %v98_v11 = vpop.permute.xlu0 %97 }
  0x8b   :  { %vm99_vm1 = vcmp.eq.s32.totalorder %v95_v10, %v98_v11 }
  0x8c   :  { %v100_v12 = vsel %vm99_vm1, %v72_v0, 0.0 }
  0x8d   :  { %v101_v13 = vsel %vm81_vm0, %v100_v12, 0.0 }
  0x8e   :  { %102 = vadd.xlane.f32.xlu1 %v101_v13 }
  0xf7   :  { %v90_v14 = vpop.xlane.xlu1 %89 }
  0xf8   :  { %171 = vlog2.f32 %v90_v14 }
  0xfe   :  { %v172_v15 = vpop.eup %171 }
  0xff   :  { %v92_v16 = vmul.f32 0.6931472, %v172_v15 }
 0x101   :  { %v93_v17 = vadd.f32 %v92_v16, %v84_v4  ;;  %v103_v18 = vpop.xlane.xlu1 %102 }
 0x103   :  { %v104_v19 = vsub.f32 %v93_v17, %v103_v18 }
 0x105   :  { %v108_v20 = vsel %vm107_vm2, %v104_v19, 0.0 }
 0x106   :  { %109 = vadd.xlane.f32.xlu2 %v108_v20 }
 0x179   :  { %v110_v22 = vpop.xlane.xlu2 %109 }
 0x17a   :  { %v111_v23 = vrot.slane %v110_v22, 4 }
 0x17c   :  { %v112_v24 = vadd.f32 %v111_v23, %v110_v22 }
 0x17e   :  { %v113_v25 = vrot.slane %v112_v24, 2 }
 0x180   :  { %v114_v26 = vadd.f32 %v113_v25, %v112_v24 }
 0x182   :  { %v115_v27 = vrot.slane %v114_v26, 1 }
 0x184   :  { %v116_v28 = vadd.f32 %v115_v27, %v114_v26 }
 0x186   :  { %161 = vpush %v116_v28 }
 0x1b7   :  { %s162_s0 = spop %161 }
 0x1b8   :  { %v118_v30 = vstv %s162_s0 }
 0x1b9   :  { %v119_v31 = vadd.f32 %v118_v30, %v106_v29 }
 0x1bb   :  { %121 = vst.msk [vmem:[#allocation2] sm:$0x1] %vm70_vm3, %v119_v31 }
 0x1c2   :  { %v168_v32 = vld [vmem:[#allocation2] ss:$0 sm:$0xff] }
 0x1c3   :  { %129 = vperm.xlu2 %167, %v168_v32  }
 0x21d   :  { %v130_v33 = vpop.permute.xlu2 %129 }
 0x21e   :  { %132 = vst [vmem:[#allocation3] sm:$0xff] %v130_v33 }
 0x21f   :  { %143 = dma.vmem_to_hbm [thread:$0]  %s139_s13, 128, %s141_s16, [#allocation4]  }
 0x220   :  { %197 = dma.done.wait [#allocation4], 128  }
 0x221   :  { %198 = vsyncadd [#allocation4], 4294967168 }
 0x222   :  { %148 = vsyncpa [#allocation4], 1 }

</bundles_post_ra>
